<compile_context>
chip_gen: v5e
topology: v5e:2x2
jax: 0.10.0
libtpu: 0.0.40
codegen_flags: <defaults>
</compile_context>

<pallas_src>
import functools

import jax
import jax.numpy as jnp
from jax.experimental import pallas as pl
from jax.experimental.pallas import tpu as pltpu


def _rup(x, m):
    return ((x + m - 1) // m) * m


# ---------------------------------------------------------------------------
# Pallas kernel 1: tiled matmul, bf16 operands, f32 accumulator.
# Epilogue can fuse bias, ReLU and per-channel (sum, sum^2) statistics.
# ---------------------------------------------------------------------------
def _matmul_kernel(*refs, relu, stats, has_bias):
    a_ref, b_ref = refs[0], refs[1]
    idx = 2
    bias_ref = None
    if has_bias:
        bias_ref = refs[idx]
        idx += 1
    o_ref = refs[idx]
    idx += 1
    st_ref = None
    if stats:
        st_ref = refs[idx]
        idx += 1
    acc_ref = refs[idx]

    k = pl.program_id(2)

    @pl.when(k == 0)
    def _():
        acc_ref[...] = jnp.zeros_like(acc_ref)

    acc_ref[...] += jnp.dot(a_ref[...], b_ref[...],
                            preferred_element_type=jnp.float32)

    @pl.when(k == pl.num_programs(2) - 1)
    def _():
        y = acc_ref[...]
        if has_bias:
            y = y + bias_ref[...]
        if relu:
            y = jnp.maximum(y, 0.0)
        o_ref[...] = y.astype(o_ref.dtype)
        if stats:
            s1 = jnp.sum(y, axis=0, keepdims=True)
            s2 = jnp.sum(y * y, axis=0, keepdims=True)
            st_ref[...] = jnp.concatenate([s1, s2], axis=0)[None, :, :]


def matmul_pl(a, b, bias=None, relu=False, compute_stats=False):
    """a: [M, K] @ b: [K, N] -> f32 [M, N] (+ optional per-column (sum, sum^2) [2, N]).

    Operands are cast to bf16 (MXU-native); accumulation and epilogue are f32.
    compute_stats requires bias=None (zero-padded rows then contribute exactly zero)."""
    M, K = a.shape
    _, N = b.shape
    if compute_stats:
        assert bias is None

    Kp = _rup(K, 128)
    tk = next(t for t in (512, 384, 256, 128) if Kp % t == 0)   # divisor of Kp -> no extra pad
    Np = _rup(N, 128)
    tn = next(t for t in (512, 256, 128) if Np % t == 0)
    Mp = _rup(M, 8)
    tm = min(512, Mp)
    Mp = _rup(Mp, tm)

    a_p = jnp.pad(a.astype(jnp.bfloat16), ((0, Mp - M), (0, Kp - K)))
    b_p = jnp.pad(b.astype(jnp.bfloat16), ((0, Kp - K), (0, Np - N)))

    inputs = [a_p, b_p]
    in_specs = [pl.BlockSpec((tm, tk), lambda i, j, k: (i, k)),
                pl.BlockSpec((tk, tn), lambda i, j, k: (k, j))]
    has_bias = bias is not None
    if has_bias:
        bias_p = jnp.pad(bias.astype(jnp.float32), (0, Np - N)).reshape(1, Np)
        inputs.append(bias_p)
        in_specs.append(pl.BlockSpec((1, tn), lambda i, j, k: (0, j)))

    out_shapes = [jax.ShapeDtypeStruct((Mp, Np), jnp.float32)]
    out_specs = [pl.BlockSpec((tm, tn), lambda i, j, k: (i, j))]
    if compute_stats:
        out_shapes.append(jax.ShapeDtypeStruct((Mp // tm, 2, Np), jnp.float32))
        out_specs.append(pl.BlockSpec((1, 2, tn), lambda i, j, k: (i, 0, j)))

    kernel = functools.partial(_matmul_kernel, relu=relu, stats=compute_stats,
                               has_bias=has_bias)
    call = pl.pallas_call(
        kernel,
        out_shape=tuple(out_shapes) if compute_stats else out_shapes[0],
        grid_spec=pltpu.PrefetchScalarGridSpec(
            num_scalar_prefetch=0,
            grid=(Mp // tm, Np // tn, Kp // tk),
            in_specs=in_specs,
            out_specs=out_specs if compute_stats else out_specs[0],
            scratch_shapes=[pltpu.VMEM((tm, tn), jnp.float32)]),
        compiler_params=pltpu.CompilerParams(
            dimension_semantics=("parallel", "parallel", "arbitrary")),
    )
    if compute_stats:
        out, st = call(*inputs)
        return out[:M, :N], jnp.sum(st, axis=0)[:, :N]
    out = call(*inputs)
    return out[:M, :N], None


# ---------------------------------------------------------------------------
# Pallas kernel 2: direct 3x3x3 conv (implicit im2col).
# One grid step = one output depth row x one Cout tile.  The 27 taps are shifted
# static slices of a guarded (Hp*Wp + guards) input row held in VMEM.
# ---------------------------------------------------------------------------
def _conv3x3_kernel(x0_ref, x1_ref, x2_ref, w_ref, bias_ref, *out_refs,
                    Wp, HWo, G, relu, stats, H, W):
    o_ref = out_refs[0]
    xs = (x0_ref, x1_ref, x2_ref)
    tn = o_ref.shape[-1]
    acc = jnp.zeros((HWo, tn), jnp.float32)
    for kd in range(3):
        xr = xs[kd]
        for kh in range(3):
            for kw in range(3):
                off = G + (kh - 1) * Wp + (kw - 1)          # static offset
                a = xr[0, pl.ds(off, HWo), :]               # (HWo, Cin) bf16
                wt = w_ref[kd * 9 + kh * 3 + kw]            # (Cin, tn) bf16
                acc = acc + jnp.dot(a, wt, preferred_element_type=jnp.float32)
    y = acc + bias_ref[...]
    if relu:
        y = jnp.maximum(y, 0.0)
    o_ref[...] = y[None, :, :].astype(o_ref.dtype)
    if stats:
        st_ref = out_refs[1]
        r = jax.lax.broadcasted_iota(jnp.int32, (HWo, 1), 0)
        hp = r // Wp
        wq = r % Wp
        valid = (hp >= 1) & (hp <= H) & (wq >= 1) & (wq <= W)
        ym = jnp.where(valid, y, 0.0)
        s1 = jnp.sum(ym, axis=0, keepdims=True)
        s2 = jnp.sum(ym * ym, axis=0, keepdims=True)
        st_ref[...] = jnp.concatenate([s1, s2], axis=0)[None, :, :]


def _conv3d_3x3_direct(x, w, b, relu, stats):
    N, D, H, W, Cin = x.shape
    Cout = w.shape[-1]
    Dp, Hp, Wp = D + 2, H + 2, W + 2
    HW = Hp * Wp
    HWo = _rup(HW, 8)
    G = _rup(Wp + 1, 8)
    HWG = G + HWo + G

    Np = _rup(Cout, 128)
    tn = 256 if (Np % 256 == 0 and 27 * Cin * 256 * 2 <= (6 << 20)) else 128
    n_j = Np // tn

    # Guarded, per-depth-row layout of the zero-padded input (bf16).
    xg = jnp.pad(x.astype(jnp.bfloat16),
                 ((0, 0), (1, 1), (1, 1), (1, 1), (0, 0)))         # [N,Dp,Hp,Wp,Cin]
    xg = xg.reshape(N * Dp, HW, Cin)
    xg = jnp.pad(xg, ((0, 0), (G, HWG - G - HW), (0, 0)))          # [N*Dp, HWG, Cin]

    wr = jnp.pad(w.reshape(27, Cin, Cout).astype(jnp.bfloat16),
                 ((0, 0), (0, 0), (0, Np - Cout)))                 # [27, Cin, Np]
    if b is None:
        bias = jnp.zeros((1, Np), jnp.float32)
    else:
        bias = jnp.pad(b.astype(jnp.float32), (0, Np - Cout)).reshape(1, Np)

    ND = N * D

    def xmap(kd):
        def im(j, od):
            return (od // D * Dp + od % D + kd, 0, 0)
        return im

    in_specs = [pl.BlockSpec((1, HWG, Cin), xmap(0)),
                pl.BlockSpec((1, HWG, Cin), xmap(1)),
                pl.BlockSpec((1, HWG, Cin), xmap(2)),
                pl.BlockSpec((27, Cin, tn), lambda j, od: (0, 0, j)),
                pl.BlockSpec((1, tn), lambda j, od: (0, j))]

    out_shapes = [jax.ShapeDtypeStruct((ND, HWo, Np), jnp.float32)]
    out_specs = [pl.BlockSpec((1, HWo, tn), lambda j, od: (od, 0, j))]
    if stats:
        out_shapes.append(jax.ShapeDtypeStruct((ND, 2, Np), jnp.float32))
        out_specs.append(pl.BlockSpec((1, 2, tn), lambda j, od: (od, 0, j)))

    kernel = functools.partial(_conv3x3_kernel, Wp=Wp, HWo=HWo, G=G,
                               relu=relu, stats=stats, H=H, W=W)
    call = pl.pallas_call(
        kernel,
        out_shape=tuple(out_shapes) if stats else out_shapes[0],
        grid_spec=pltpu.PrefetchScalarGridSpec(
            num_scalar_prefetch=0,
            grid=(n_j, ND),                                   # weights stay resident per j
            in_specs=in_specs,
            out_specs=out_specs if stats else out_specs[0]),
        compiler_params=pltpu.CompilerParams(
            dimension_semantics=("parallel", "parallel")),
    )
    if stats:
        out_full, st_full = call(xg, xg, xg, wr, bias)
        st = jnp.sum(st_full, axis=0)[:, :Cout]
    else:
        out_full = call(xg, xg, xg, wr, bias)
        st = None

    out = out_full[:, :HW, :Cout].reshape(N, D, Hp, Wp, Cout)[:, :, 1:H + 1, 1:W + 1, :]
    return out, st


def _conv3d_3x3_im2col(x, w, b, relu, stats):
    """Fallback for tiny-channel inputs: explicit bf16 im2col + fused-K matmul."""
    N, D, H, W, Cin = x.shape
    Cout = w.shape[-1]
    if stats:
        assert b is None
    xp = jnp.pad(x.astype(jnp.bfloat16), ((0, 0), (1, 1), (1, 1), (1, 1), (0, 0)))
    patches = []
    for kd in range(3):
        for kh in range(3):
            for kw in range(3):
                patches.append(xp[:, kd:kd + D, kh:kh + H, kw:kw + W, :])
    pat = jnp.stack(patches, axis=-2)                        # [N,D,H,W,27,Cin] bf16
    a = pat.reshape(N * D * H * W, 27 * Cin)
    out2d, st = matmul_pl(a, w.reshape(27 * Cin, Cout), b,
                          relu=relu, compute_stats=stats)
    return out2d.reshape(N, D, H, W, Cout), st


def conv3d_3x3(x, w, b=None, relu=False, stats=False):
    """3x3x3 'same' Conv3d in NDHWC.  w: [3,3,3,Cin,Cout].  Returns (out, stats_or_None)."""
    Cin = x.shape[-1]
    H, W = x.shape[2], x.shape[3]
    Wp = W + 2
    HWG = 2 * _rup(Wp + 1, 8) + _rup((H + 2) * Wp, 8)
    if Cin >= 32 and HWG * Cin * 2 <= (2 << 20):             # VMEM-safe -> direct kernel
        return _conv3d_3x3_direct(x, w, b, relu=relu, stats=stats)
    return _conv3d_3x3_im2col(x, w, b, relu=relu, stats=stats)


def conv1x1(x, w, b=None, relu=False, stats=False):
    """x: [N,D,H,W,Cin]; w: [Cin,Cout]."""
    N, D, H, W, Cin = x.shape
    Cout = w.shape[-1]
    out2d, st = matmul_pl(x.reshape(-1, Cin), w, b, relu=relu, compute_stats=stats)
    return out2d.reshape(N, D, H, W, Cout), st


def conv_transpose3d_2(x, w, b):
    """ConvTranspose3d kernel=2 stride=2.  w: [Cin,2,2,2,Cout]; b: [Cout]."""
    N, D, H, W, Cin = x.shape
    Cout = w.shape[-1]
    bias8 = jnp.tile(b, 8)                                   # column order: (tap, cout)
    out, _ = matmul_pl(x.reshape(-1, Cin), w.reshape(Cin, 8 * Cout), bias8)
    out = out.reshape(N, D, H, W, 2, 2, 2, Cout)
    out = jnp.transpose(out, (0, 1, 4, 2, 5, 3, 6, 7))
    # TODO(synk): fold this 2x2x2 interleave into the matmul epilogue via a strided out
    # index_map to save one HBM round trip of the upsampled tensor.
    return out.reshape(N, 2 * D, 2 * H, 2 * W, Cout)


# ---------------------------------------------------------------------------
# Pallas kernel 3: fused affine (BN) [+ residual] [+ ReLU] [+ output stats].
# ---------------------------------------------------------------------------
def _affine_kernel(*refs, relu, has_res, stats, m_valid, tm):
    x_ref, s_ref, b_ref = refs[0], refs[1], refs[2]
    idx = 3
    r_ref = None
    if has_res:
        r_ref = refs[idx]
        idx += 1
    o_ref = refs[idx]
    idx += 1
    st_ref = refs[idx] if stats else None

    y = x_ref[...] * s_ref[...] + b_ref[...]
    if has_res:
        y = y + r_ref[...]
    if relu:
        y = jnp.maximum(y, 0.0)
    o_ref[...] = y
    if stats:
        row = jax.lax.broadcasted_iota(jnp.int32, (tm, 1), 0)
        valid = (pl.program_id(0) * tm + row) < m_valid
        ym = jnp.where(valid, y, 0.0)
        s1 = jnp.sum(ym, axis=0, keepdims=True)
        s2 = jnp.sum(ym * ym, axis=0, keepdims=True)
        st_ref[...] = jnp.concatenate([s1, s2], axis=0)[None, :, :]


def affine_act_pl(x2d, scale, bias, residual=None, relu=True, compute_stats=False):
    """y = x*scale + bias [+ residual] [ReLU] on [M, C]; optionally emit (sum, sum^2)[2, C].

    Small channel counts are repacked lane-dense ([M, C] -> [M*C/128, 128]) instead of
    padding C up to 128."""
    M, C = x2d.shape
    repack = (C < 128) and (128 % C == 0) and ((M * C) % 128 == 0)
    if repack:
        reps = 128 // C
        Mw, Cw = M * C // 128, 128
        xw = x2d.reshape(Mw, Cw)
        sw = jnp.tile(scale.astype(jnp.float32), reps).reshape(1, Cw)
        bw = jnp.tile(bias.astype(jnp.float32), reps).reshape(1, Cw)
        rw = residual.reshape(Mw, Cw) if residual is not None else None
    else:
        Cw, Mw = _rup(C, 128), M
        xw = jnp.pad(x2d, ((0, 0), (0, Cw - C)))
        sw = jnp.pad(scale.astype(jnp.float32), (0, Cw - C)).reshape(1, Cw)
        bw = jnp.pad(bias.astype(jnp.float32), (0, Cw - C)).reshape(1, Cw)
        rw = jnp.pad(residual, ((0, 0), (0, Cw - C))) if residual is not None else None

    tm = min(512, _rup(Mw, 8))
    Mp = _rup(Mw, tm)
    xw = jnp.pad(xw, ((0, Mp - Mw), (0, 0)))
    inputs = [xw, sw, bw]
    in_specs = [pl.BlockSpec((tm, Cw), lambda i: (i, 0)),
                pl.BlockSpec((1, Cw), lambda i: (0, 0)),
                pl.BlockSpec((1, Cw), lambda i: (0, 0))]
    if rw is not None:
        rw = jnp.pad(rw, ((0, Mp - Mw), (0, 0)))
        inputs.append(rw)
        in_specs.append(pl.BlockSpec((tm, Cw), lambda i: (i, 0)))

    out_shapes = [jax.ShapeDtypeStruct((Mp, Cw), jnp.float32)]
    out_specs = [pl.BlockSpec((tm, Cw), lambda i: (i, 0))]
    if compute_stats:
        out_shapes.append(jax.ShapeDtypeStruct((Mp // tm, 2, Cw), jnp.float32))
        out_specs.append(pl.BlockSpec((1, 2, Cw), lambda i: (i, 0, 0)))

    kernel = functools.partial(_affine_kernel, relu=relu, has_res=rw is not None,
                               stats=compute_stats, m_valid=Mw, tm=tm)
    call = pl.pallas_call(
        kernel,
        out_shape=tuple(out_shapes) if compute_stats else out_shapes[0],
        grid_spec=pltpu.PrefetchScalarGridSpec(
            num_scalar_prefetch=0,
            grid=(Mp // tm,),
            in_specs=in_specs,
            out_specs=out_specs if compute_stats else out_specs[0]),
        compiler_params=pltpu.CompilerParams(dimension_semantics=("parallel",)),
    )
    if compute_stats:
        out, st = call(*inputs)
    else:
        out = call(*inputs)
        st = None

    out = out[:Mw, :]
    if repack:
        out = out.reshape(M, C)
        if st is not None:
            st = jnp.sum(st, axis=0).reshape(2, 128 // C, C).sum(axis=1)
    else:
        out = out[:, :C]
        if st is not None:
            st = jnp.sum(st, axis=0)[:, :C]
    return out, st


def bn_affine(x5, in_stats, relu=True, residual2d=None, emit_stats=False, eps=1e-5):
    """PyTorch training-mode BatchNorm3d (gamma=1, beta=0) using fused (sum, sum^2) stats
    of x5, + optional residual-add and ReLU.  Optionally emits stats of its own output."""
    N, D, H, W, C = x5.shape
    M = N * D * H * W
    mean = in_stats[0] / M
    var = jnp.maximum(in_stats[1] / M - mean * mean, 0.0)     # biased variance
    scale = jax.lax.rsqrt(var + eps)
    shift = -mean * scale
    out2d, st = affine_act_pl(x5.reshape(M, C), scale, shift,
                              residual=residual2d, relu=relu,
                              compute_stats=emit_stats)
    out = out2d.reshape(N, D, H, W, C)
    return (out, st) if emit_stats else out


# ---------------------------------------------------------------------------
# Pallas kernel 4: MaxPool3d 2x2x2 stride 2 (single [8, M, C] input).
# ---------------------------------------------------------------------------
def _max8_kernel(x_ref, o_ref):
    o_ref[...] = jnp.max(x_ref[...], axis=0)


def maxpool2(x):
    N, D, H, W, C = x.shape
    xr = x.reshape(N, D // 2, 2, H // 2, 2, W // 2, 2, C)
    xr = jnp.transpose(xr, (2, 4, 6, 0, 1, 3, 5, 7)).reshape(8, -1, C)
    M = xr.shape[1]
    tm = min(512, _rup(M, 8))
    Mp = _rup(M, tm)
    xr = jnp.pad(xr, ((0, 0), (0, Mp - M), (0, 0)))
    out = pl.pallas_call(
        _max8_kernel,
        out_shape=jax.ShapeDtypeStruct((Mp, C), jnp.float32),
        grid_spec=pltpu.PrefetchScalarGridSpec(
            num_scalar_prefetch=0,
            grid=(Mp // tm,),
            in_specs=[pl.BlockSpec((8, tm, C), lambda i: (0, i, 0))],
            out_specs=pl.BlockSpec((tm, C), lambda i: (i, 0))),
        compiler_params=pltpu.CompilerParams(dimension_semantics=("parallel",)),
    )(xr)
    return out[:M].reshape(N, D // 2, H // 2, W // 2, C)


# ---------------------------------------------------------------------------
# Module blocks
# ---------------------------------------------------------------------------
def res2block(x, p, scale=4, emit_stats=False):
    """Res2block: conv1x1 -> split -> chained 3x3 convs -> conv1x1 + residual (+ ReLU)."""
    N, D, H, W, C = x.shape
    residual2d = x.reshape(-1, C)

    out, st = conv1x1(x, p['w1'], stats=True)                 # no bias (BN follows)
    out = bn_affine(out, st, relu=True)

    cw = C // scale
    spx = [out[..., i * cw:(i + 1) * cw] for i in range(scale)]
    parts = []
    sp = None
    for i in range(scale - 1):
        sp = spx[i] if i == 0 else sp + spx[i]
        sp, st = conv3d_3x3(sp, p['wconv'][i], None, stats=True)
        sp = bn_affine(sp, st, relu=True)
        parts.append(sp)
    parts.append(spx[scale - 1])
    out = jnp.concatenate(parts, axis=-1)

    out, st = conv1x1(out, p['w3'], stats=True)
    return bn_affine(out, st, relu=True, residual2d=residual2d, emit_stats=emit_stats)


def down_double(x, p):
    x, st = res2block(x, p['res'], emit_stats=True)
    x = bn_affine(x, st, relu=True)
    x, st = conv3d_3x3(x, p['w'], None, stats=True)           # bias dropped: cancelled by BN
    x = bn_affine(x, st, relu=True)
    return x


def up_double(x, p):
    x, st = conv3d_3x3(x, p['w'], None, stats=True)           # bias dropped: cancelled by BN
    x = bn_affine(x, st, relu=True)
    x, st = res2block(x, p['res'], emit_stats=True)
    x = bn_affine(x, st, relu=True)
    return x


def amea_forward(x_ncdhw, P):
    x = jnp.transpose(x_ncdhw, (0, 2, 3, 4, 1))               # NCDHW -> NDHWC

    # conv0: Conv3d -> Res2block -> (ReLU is a no-op: Res2block ends in ReLU) -> Conv3d+ReLU
    c, _ = conv3d_3x3(x, P['conv0_w'], P['conv0_b'])
    c = res2block(c, P['conv0_res'])
    c0, _ = conv3d_3x3(c, P['conv0b_w'], P['conv0b_b'], relu=True)

    p1 = maxpool2(c0)
    c1 = down_double(p1, P['conv1'])
    p2 = maxpool2(c1)
    c2 = down_double(p2, P['conv2'])
    p3 = maxpool2(c2)
    c3 = down_double(p3, P['bridge'])

    up_1 = conv_transpose3d_2(c3, P['up1_w'], P['up1_b'])
    merge5 = jnp.concatenate([up_1, c2], axis=-1)
    c4 = up_double(merge5, P['conv4'])
    o, st = conv3d_3x3(c4, P['outl2_w'], None, stats=True)    # bias cancelled by BNl2
    output_l2 = bn_affine(o, st, relu=False)

    up_2 = conv_transpose3d_2(c4, P['up2_w'], P['up2_b'])
    merge6 = jnp.concatenate([up_2, c1], axis=-1)
    c5 = up_double(merge6, P['conv5'])
    o, st = conv3d_3x3(c5, P['outl1_w'], None, stats=True)    # bias cancelled by BNl1
    output_l1 = bn_affine(o, st, relu=False)

    up_3 = conv_transpose3d_2(c5, P['up3_w'], P['up3_b'])
    merge7 = jnp.concatenate([up_3, c0], axis=-1)
    c6 = up_double(merge7, P['conv6'])
    o, st = conv3d_3x3(c6, P['conv7_w'], None, stats=True)    # bias cancelled by BN3d
    out = bn_affine(o, st, relu=False)

    tr = lambda t: jnp.transpose(t, (0, 4, 1, 2, 3))          # NDHWC -> NCDHW
    return tr(out), tr(output_l1), tr(output_l2)


# ---------------------------------------------------------------------------
# Deterministic parameter initialization (synthetic weights, PyTorch-equivalent shapes;
# NOTE: Conv3d weights are stored as [3,3,3,Cin,Cout], ConvTranspose3d as [Cin,2,2,2,Cout] —
# real PyTorch checkpoints would need an explicit transpose).
# ---------------------------------------------------------------------------
def init_params(key, in_channels, out_channels):
    keys = iter(jax.random.split(key, 128))

    def w(shape, fan_in):
        return jax.random.normal(next(keys), shape, jnp.float32) / jnp.sqrt(float(fan_in))

    def b(n):
        return 0.01 * jax.random.normal(next(keys), (n,), jnp.float32)

    def res_p(C):
        cw = C // 4
        return dict(w1=w((C, C), C),
                    wconv=[w((3, 3, 3, cw, cw), 27 * cw) for _ in range(3)],
                    w3=w((C, C), C))

    def down_p(cin, cout):
        return dict(res=res_p(cin), w=w((3, 3, 3, cin, cout), 27 * cin), b=b(cout))

    def up_p(cin, cout):
        return dict(w=w((3, 3, 3, cin, cout), 27 * cin), b=b(cout), res=res_p(cout))

    P = dict(
        conv0_w=w((3, 3, 3, in_channels, 32), 27 * in_channels), conv0_b=b(32),
        conv0_res=res_p(32),
        conv0b_w=w((3, 3, 3, 32, 64), 27 * 32), conv0b_b=b(64),
        conv1=down_p(64, 128),
        conv2=down_p(128, 256),
        bridge=down_p(256, 512),
        outl2_w=w((3, 3, 3, 256, out_channels), 27 * 256), outl2_b=b(out_channels),
        outl1_w=w((3, 3, 3, 128, out_channels), 27 * 128), outl1_b=b(out_channels),
        up1_w=w((512, 2, 2, 2, 512), 512), up1_b=b(512),
        conv4=up_p(768, 256),
        up2_w=w((256, 2, 2, 2, 256), 256), up2_b=b(256),
        conv5=up_p(384, 128),
        up3_w=w((128, 2, 2, 2, 128), 128), up3_b=b(128),
        conv6=up_p(192, 64),
        conv7_w=w((3, 3, 3, 64, out_channels), 27 * 64), conv7_b=b(out_channels),
    )
    return P


if __name__ == "__main__":
    key = jax.random.PRNGKey(0)
    pkey, xkey = jax.random.split(key)

    in_channels, out_channels = 1, 2
    params = init_params(pkey, in_channels, out_channels)

    # NCDHW input, spatial 8 (divisible by the 3 maxpool stages), batch 2.
    x = jax.random.normal(xkey, (2, in_channels, 8, 8, 8), jnp.float32)

    out, out_l1, out_l2 = amea_forward(x, params)
    out, out_l1, out_l2 = jax.block_until_ready((out, out_l1, out_l2))

    assert out.shape == (2, out_channels, 8, 8, 8), out.shape
    assert out_l1.shape == (2, out_channels, 4, 4, 4), out_l1.shape
    assert out_l2.shape == (2, out_channels, 2, 2, 2), out_l2.shape
    assert jnp.all(jnp.isfinite(out))
    assert jnp.all(jnp.isfinite(out_l1))
    assert jnp.all(jnp.isfinite(out_l2))

    print("KERNEL_OK")
</pallas_src>

<mosaic_0001>
module attributes {stable_mosaic.version = 11 : i64} {
  func.func @_matmul_kernel(%arg0: i32, %arg1: i32, %arg2: i32, %arg3: memref<512x128xbf16, #tpu.memory_space<vmem>>, %arg4: memref<128x128xbf16, #tpu.memory_space<vmem>>, %arg5: memref<1x128xf32, #tpu.memory_space<vmem>>, %arg6: memref<512x128xf32, #tpu.memory_space<vmem>>, %arg7: memref<512x128xf32, #tpu.memory_space<vmem>>) attributes {dimension_semantics = [#tpu.dimension_semantics<parallel>, #tpu.dimension_semantics<parallel>, #tpu.dimension_semantics<arbitrary>], iteration_bounds = array<i64: 2, 1, 1>, scalar_prefetch = 0 : i64, scratch_operands = 1 : i64, tpu.core_type = #tpu.core_type<tc>, window_params = [{transform_indices = @transform_0, window_bounds = array<i64: 512, 128>}, {transform_indices = @transform_1, window_bounds = array<i64: 128, 128>}, {transform_indices = @transform_2, window_bounds = array<i64: 1, 128>}, {transform_indices = @transform_3, window_bounds = array<i64: 512, 128>}]} {
    %c0_i32 = arith.constant 0 : i32
    %0 = arith.cmpi eq, %arg2, %c0_i32 : i32
    %1 = arith.extui %0 : i1 to i32
    %c0_i32_0 = arith.constant 0 : i32
    %2 = arith.cmpi ne, %1, %c0_i32_0 : i32
    scf.if %2 {
      %cst_10 = arith.constant 0.000000e+00 : f32
      %12 = vector.broadcast %cst_10 : f32 to vector<512x128xf32>
      %c0_11 = arith.constant 0 : index
      %c0_12 = arith.constant 0 : index
      %13 = vector.load %arg7[%c0_11, %c0_12] : memref<512x128xf32, #tpu.memory_space<vmem>>, vector<512x128xf32>
      tpu.vector_store %arg7[%c0_11, %c0_12], %12 {strides = array<i32>} : memref<512x128xf32, #tpu.memory_space<vmem>>, vector<512x128xf32>,
    } else {
    }
    %c0 = arith.constant 0 : index
    %c0_1 = arith.constant 0 : index
    %3 = vector.load %arg7[%c0, %c0_1] : memref<512x128xf32, #tpu.memory_space<vmem>>, vector<512x128xf32>
    %c0_2 = arith.constant 0 : index
    %c0_3 = arith.constant 0 : index
    %4 = vector.load %arg3[%c0_2, %c0_3] : memref<512x128xbf16, #tpu.memory_space<vmem>>, vector<512x128xbf16>
    %c0_4 = arith.constant 0 : index
    %c0_5 = arith.constant 0 : index
    %5 = vector.load %arg4[%c0_4, %c0_5] : memref<128x128xbf16, #tpu.memory_space<vmem>>, vector<128x128xbf16>
    %cst = arith.constant dense<0.000000e+00> : vector<512x128xf32>
    %6 = tpu.matmul %4, %5, %cst {dimension_numbers = #tpu.dot_dimension_numbers<[1], [0], [0], [1], [0, 0, 1, 1], [], []>} : vector<512x128xbf16>, vector<128x128xbf16>, vector<512x128xf32> -> vector<512x128xf32>
    %7 = arith.addf %3, %6 : vector<512x128xf32>
    %c0_6 = arith.constant 0 : index
    %c0_7 = arith.constant 0 : index
    %8 = vector.load %arg7[%c0_6, %c0_7] : memref<512x128xf32, #tpu.memory_space<vmem>>, vector<512x128xf32>
    tpu.vector_store %arg7[%c0_6, %c0_7], %7 {strides = array<i32>} : memref<512x128xf32, #tpu.memory_space<vmem>>, vector<512x128xf32>,
    %c0_i32_8 = arith.constant 0 : i32
    %9 = arith.cmpi eq, %arg2, %c0_i32_8 : i32
    %10 = arith.extui %9 : i1 to i32
    %c0_i32_9 = arith.constant 0 : i32
    %11 = arith.cmpi ne, %10, %c0_i32_9 : i32
    scf.if %11 {
      %c0_10 = arith.constant 0 : index
      %c0_11 = arith.constant 0 : index
      %12 = vector.load %arg7[%c0_10, %c0_11] : memref<512x128xf32, #tpu.memory_space<vmem>>, vector<512x128xf32>
      %c0_12 = arith.constant 0 : index
      %c0_13 = arith.constant 0 : index
      %13 = vector.load %arg5[%c0_12, %c0_13] : memref<1x128xf32, #tpu.memory_space<vmem>>, vector<1x128xf32>
      %14 = vector.broadcast %13 : vector<1x128xf32> to vector<512x128xf32>
      %15 = arith.addf %12, %14 : vector<512x128xf32>
      %c0_14 = arith.constant 0 : index
      %c0_15 = arith.constant 0 : index
      %16 = vector.load %arg6[%c0_14, %c0_15] : memref<512x128xf32, #tpu.memory_space<vmem>>, vector<512x128xf32>
      tpu.vector_store %arg6[%c0_14, %c0_15], %15 {strides = array<i32>} : memref<512x128xf32, #tpu.memory_space<vmem>>, vector<512x128xf32>,
    } else {
    }
    return
  }
  func.func @transform_0(%arg0: i32, %arg1: i32, %arg2: i32) -> (i32, i32) {
    %c0_i32 = arith.constant 0 : i32
    return %arg0, %arg2 : i32, i32
  }
  func.func @transform_1(%arg0: i32, %arg1: i32, %arg2: i32) -> (i32, i32) {
    %c0_i32 = arith.constant 0 : i32
    return %arg2, %arg1 : i32, i32
  }
  func.func @transform_2(%arg0: i32, %arg1: i32, %arg2: i32) -> (i32, i32) {
    %c0_i32 = arith.constant 0 : i32
    %c0_i32_0 = arith.constant 0 : i32
    return %c0_i32, %arg1 : i32, i32
  }
  func.func @transform_3(%arg0: i32, %arg1: i32, %arg2: i32) -> (i32, i32) {
    %c0_i32 = arith.constant 0 : i32
    return %arg0, %arg1 : i32, i32
  }
}

</mosaic_0001>

<bundles_post_ra>
// kernel: tpu_custom_call.1
= control target key start
LH: loop header
LB: loop body
LE: loop exit
PB: predicated region body
PF: predicated region fallthrough
CT: control target
= control target key end

     0   :  { %s2160_s0 = inlined_call_operand.hbm [shape: bf16[1024,128], index: 0, kind: input, shape index: {}]   ;;  %s2161_s1 = inlined_call_operand.hbm [shape: bf16[128,128], index: 1, kind: input, shape index: {}]   ;;  %s2162_s2 = inlined_call_operand.vmem [shape: f32[1,128], index: 2, kind: input, shape index: {}]   ;;  %s2163_s3 = inlined_call_operand.hbm [shape: f32[1024,128], index: 3, kind: output, shape index: {}]  }
   0x1   :  { %2165 = sst [smem:[#allocation12_spill]] %s2161_s1 }
   0x2   :  { %8 = vsyncpa [#allocation4], 0 }
   0x3   :  { %10 = vsyncpa [#allocation4 + $0x1], 0 }
   0x4   :  { %11 = vsyncpa [#allocation7], 0 }
   0x5   :  { %12 = vsyncpa [#allocation5], 0 }
   0x6   :  { %14 = vsyncpa [#allocation5 + $0x1], 0  ;;  %s1834_s12 = smov 0   ;;  %s1836_s13 = smov 0  }
   0x7   :  { %s1838_s14 = smov 0   ;;  %s1840_s15 = smov 0  }
   0x8   :  { %s1842_s16 = smov 0   ;;  %s1844_s17 = smov 0  }
   0x9 LB: > { %s1339_s18 = sadd.s32 4294967295, %s1807_s17   ;;  %s1340_s19 = sadd.s32 4294967294, %s1807_s17   ;;  %s1807_s17 = sphi %s1844_s17, %s20_s17   ;;  %s1803_s16 = sphi %s1842_s16, %s2179_s16   ;;  %s1799_s15 = sphi %s1840_s15, %s2178_s15   ;;  %s1795_s14 = sphi %s1838_s14, %s2177_s14   ;;  %s1791_s13 = sphi %s1836_s13, %s2176_s13   ;;  %s1787_s12 = sphi %s1834_s12, %s2175_s12  }
   0xa   : > { %p61_p0 = scmp.ne.s32.totalorder %s1791_s13, %s1787_s12  ;;  %p1868_p1 = scmp.eq.s32.totalorder %s1339_s18, 0 }
   0xb   : > { %p1872_p2 = scmp.eq.s32.totalorder %s1339_s18, 1  ;;  %p147_p3 = scmp.eq.s32.totalorder %s1340_s19, 1 }
   0xc   : > { %p1878_p4 = por %p1868_p1, %p61_p0  ;;  %p1341_p5 = scmp.ge.s32.totalorder %s1807_s17, 1 }
   0xd   : > { %p1883_p6 = por %p147_p3, %p61_p0  ;;  %p154_p7 = scmp.lt.s32.totalorder %s1807_s17, 3 }
   0xe   : > { %s2170_s1 = sld [smem:[#allocation12_spill]]  ;;  %s1809_s28 = smov [#allocation6]  }
   0xf   : > { %p1891_p8 = pnand %p1341_p5, %p154_p7  ;;  %s171_s29 = sshll.u32 %s1809_s28, 4  ;;  %s172_s29 = int_to_ptr.vmem [resolvable:$true] %s171_s29 }
  0x10   : > { %p1344_p11 = scmp.ge.s32.totalorder %s1807_s17, 2  ;;  %s2164_s30 = smov 64  }
  0x11   : > { %p1591_p9 = pneg %p1891_p8  ;;  %s1811_s4 = smov 4  }
  0x12   : > { %s39_s5 = sadd.s32 1, %s1803_s16  ;;  %s48_s6 = sadd.s32 1, %s1795_s14 }
  0x13   : > { %p1592_p10 = pnand %p1591_p9, %p1868_p1  ;;  %p41_p12 = scmp.ge.s32.totalorder %s39_s5, 2 }
  0x14   : > { %s169_s26 = sshll.u32 %s2170_s1, 4  ;;  %p55_p13 = scmp.ne.s32.totalorder %s1795_s14, %s1791_s13  ;;  %s170_s26 = int_to_ptr.hbm [resolvable:$true] %s169_s26 }
  0x15   : > { %1594 = dma.hbm_to_vmem [thread:$0]  (!%p1592_p10), %s170_s26, 1024, %s172_s29, [#allocation7], %s2164_s30, %s2164_s30, %s1811_s4  }
  0x16   : > { %p56_p0 = scmp.eq.s32.totalorder %s1807_s17, 0  ;;  %s2181_s5 = smov (%p41_p12, %s39_s5), 0 }
  0x17   : > { %p1916_p5 = por %p1872_p2, %p55_p13  ;;  %s43_s9 = ssub.s32 %s1803_s16, %s2181_s5 }
  0x18   : > { %p1910_p3 = por %p56_p0, %p55_p13  ;;  %p1604_p7 = scmp.lt.s32.totalorder %s1807_s17, 2 }
  0x19   : > { %p46_p9 = scmp.eq.s32.totalorder %s43_s9, 0  ;;  %s191_s10 = sand.u32 1, %s1795_s14  }
  0x1a   : > { %s1345_s11 = sshll.u32 %s191_s10, 8  ;;  %s1517_s19 = sshll.u32 %s1803_s16, 8 }
  0x1b   : > { %s1925_s18 = scalar_select %p46_p9, %s1795_s14, %s48_s6  }
  0x1c   : > { %s201_s26 = scalar_lea.hbm %s2160_s0, %s1517_s19  ;;  %s195_s28 = scalar_lea.vmem [#allocation3], %s1345_s11 }
  0x1d   : > { %s204_s29 = sshll.u32 %s195_s28, 4  ;;  %s202_s21 = sshll.u32 %s201_s26, 4  ;;  %s205_s29 = int_to_ptr.vmem [resolvable:$true] %s204_s29  ;;  %s203_s21 = int_to_ptr.hbm [resolvable:$true] %s202_s21 }
  0x1e   : > { %p1596_p2 = pnand %p1604_p7, %p1910_p3  ;;  %s192_s30 = scalar_lea.sflag [#allocation4], %s191_s10 }
  0x1f   : > { %s2174_s1 = smov 64   ;;  %216 = sbr.rel (%p1891_p8) target bundleno = 331 (0x14b), region = 32 }
  0x20   : > { %1598 = dma.hbm_to_vmem [thread:$0]  (!%p1596_p2), %s203_s21, 4096, %s205_s29, %s192_s30, %s2174_s1, %s2174_s1, %s1811_s4  }
  0x21   : > { %s1939_s6 = sand.u32 (!%p1891_p8), 1, %s1791_s13  }
  0x22   : > { %s1349_s9 = sshll.u32 (!%p1891_p8), %s1939_s6, 8  ;;  %s219_s11 = scalar_lea.sflag (!%p1891_p8), [#allocation4], %s1939_s6 }
  0x23   : > { %s1943_s19 = scalar_lea.vmem (!%p1891_p8), [#allocation3], %s1349_s9 }
  0x24   : > { %1774 = dma.done.wait (%p1878_p4), %s219_s11, 4096  }
  0x25   : > { %1776 = vsyncadd (%p1878_p4), %s219_s11, 4294963200 }
  0x26   : > { %1778 = dma.done.wait (%p1868_p1), [#allocation7], 1024  }
  0x27   : > { %1780 = vsyncadd (%p1868_p1), [#allocation7], 4294966272  ;;  %v1557_v0 = vld [vmem:[#allocation6 + $0x38] sm:$0xff]  ;;  %v1556_v1 = vld [vmem:[#allocation6 + $0x30] sm:$0xff]  ;;  %s1351_s1 = sshll.u32 %s1939_s6, 9  ;;  %s1558_s30 = sshll.u32 %s1799_s15, 9 }
  0x28   : > { %712 = vmatpush.bf16.msra.mxu0 %v1557_v0  ;;  %1559 = vmatpush.bf16.msra.mxu1 %v1557_v0  ;;  %v1555_v2 = vld [vmem:[#allocation6 + $0x28] sm:$0xff]  ;;  %v1554_v3 = vld [vmem:[#allocation6 + $0x20] sm:$0xff]  ;;  %v1553_v4 = vld [vmem:[#allocation6 + $0x18] sm:$0xff]  ;;  %s1993_s27 = scalar_lea.vmem [#allocation8], %s1351_s1  ;;  %s1221_s10 = scalar_lea.hbm %s2163_s3, %s1558_s30 }
  0x29   : > { %1560 = vmatpush.bf16.msra.mxu2 %v1557_v0  ;;  %1561 = vmatpush.bf16.msra.mxu3 %v1557_v0  ;;  %v1552_v5 = vld [vmem:[#allocation6 + $0x10] sm:$0xff]  ;;  %v1551_v6 = vld [vmem:[#allocation6 + $0x8] sm:$0xff]  ;;  %v1550_v7 = vld [vmem:[#allocation6] sm:$0xff]  ;;  %s1222_s15 = sshll.u32 %s1993_s27, 4  ;;  %s1224_s24 = sshll.u32 %s1221_s10, 4  ;;  %s1223_s15 = int_to_ptr.vmem [resolvable:$true] %s1222_s15  ;;  %s1225_s24 = int_to_ptr.hbm [resolvable:$true] %s1224_s24 }
  0x2a   : > { %v1518_v8 = vld [vmem:[%s1943_s19] sm:$0xff]  ;;  %v1519_v12 = vld [vmem:[%s1943_s19 + $0x8] sm:$0xff]  ;;  %v1520_v16 = vld [vmem:[%s1943_s19 + $0x10] sm:$0xff]  ;;  %s1209_s25 = scalar_lea.sflag [#allocation5], %s1939_s6  ;;  %s1735_s26 = sshra.s32 %s1225_s24, 4  ;;  %s1736_s26 = int_to_ptr.hbm [resolvable:$true] %s1735_s26 }
  0x2b   : > { %v1526_v9 = vld [vmem:[%s1943_s19 + $0x40] sm:$0xff]  ;;  %v1527_v13 = vld [vmem:[%s1943_s19 + $0x48] sm:$0xff]  ;;  %v1528_v17 = vld [vmem:[%s1943_s19 + $0x50] sm:$0xff]  ;;  %s1737_s28 = scalar_lea.hbm %s1736_s26, 512  ;;  %s1741_s9 = scalar_lea.hbm %s2163_s3, 1024 }
  0x2c   : > { %713 = vmatpush.bf16.msra.mxu0 %v1556_v1  ;;  %1562 = vmatpush.bf16.msra.mxu1 %v1556_v1  ;;  %v1534_v10 = vld [vmem:[%s1943_s19 + $0x80] sm:$0xff]  ;;  %v1535_v14 = vld [vmem:[%s1943_s19 + $0x88] sm:$0xff]  ;;  %v1536_v18 = vld [vmem:[%s1943_s19 + $0x90] sm:$0xff]  ;;  %p1738_p1 = scmp.ne.s32.totalorder %s1736_s26, %s1737_s28  ;;  %p1742_p10 = scmp.lt.s32.totalorder %s1736_s26, %s2163_s3 }
  0x2d   : > { %1563 = vmatpush.bf16.msra.mxu2 %v1556_v1  ;;  %1564 = vmatpush.bf16.msra.mxu3 %v1556_v1  ;;  %v1542_v11 = vld [vmem:[%s1943_s19 + $0xc0] sm:$0xff]  ;;  %v1543_v15 = vld [vmem:[%s1943_s19 + $0xc8] sm:$0xff]  ;;  %v1544_v19 = vld [vmem:[%s1943_s19 + $0xd0] sm:$0xff]  ;;  %p1743_p12 = scmp.lt.s32.totalorder %s1741_s9, %s1737_s28 }
  0x2e   : > { %v1521_v20 = vld [vmem:[%s1943_s19 + $0x18] sm:$0xff]  ;;  %v1522_v24 = vld [vmem:[%s1943_s19 + $0x20] sm:$0xff]  ;;  %v1523_v28 = vld [vmem:[%s1943_s19 + $0x28] sm:$0xff]  ;;  %p1739_p4 = pnand %p1738_p1, %p1916_p5 }
  0x2f   : > { %v1529_v21 = vld [vmem:[%s1943_s19 + $0x58] sm:$0xff]  ;;  %v1530_v25 = vld [vmem:[%s1943_s19 + $0x60] sm:$0xff]  ;;  %v1531_v29 = vld [vmem:[%s1943_s19 + $0x68] sm:$0xff]  ;;  %p1744_p13 = por %p1743_p12, %p1742_p10 }
  0x30   : > { %714 = vmatpush.bf16.msra.mxu0 %v1555_v2  ;;  %1565 = vmatpush.bf16.msra.mxu1 %v1555_v2  ;;  %v1537_v22 = vld [vmem:[%s1943_s19 + $0x98] sm:$0xff]  ;;  %v1538_v26 = vld [vmem:[%s1943_s19 + $0xa0] sm:$0xff]  ;;  %v1539_v30 = vld [vmem:[%s1943_s19 + $0xa8] sm:$0xff]  ;;  %p1740_p8 = pneg %p1739_p4 }
  0x31   : > { %1566 = vmatpush.bf16.msra.mxu2 %v1555_v2  ;;  %1567 = vmatpush.bf16.msra.mxu3 %v1555_v2  ;;  %v1545_v23 = vld [vmem:[%s1943_s19 + $0xd8] sm:$0xff]  ;;  %v1546_v27 = vld [vmem:[%s1943_s19 + $0xe0] sm:$0xff]  ;;  %v1547_v31 = vld [vmem:[%s1943_s19 + $0xe8] sm:$0xff] }
  0x32   : > { %v1524_v32 = vld [vmem:[%s1943_s19 + $0x30] sm:$0xff]  ;;  %v1525_v36 = vld [vmem:[%s1943_s19 + $0x38] sm:$0xff]  ;;  %v1989_v40 = vld [vmem:[%s2162_s2] ss:$0 sm:$0xff]  ;;  %p1745_p0 = pnand %p1744_p13, %p1740_p8 }
  0x33   : > { %v1532_v33 = vld [vmem:[%s1943_s19 + $0x70] sm:$0xff]  ;;  %v1533_v37 = vld [vmem:[%s1943_s19 + $0x78] sm:$0xff] }
  0x34   : > { %715 = vmatpush.bf16.msra.mxu0 %v1554_v3  ;;  %1568 = vmatpush.bf16.msra.mxu1 %v1554_v3  ;;  %v1540_v34 = vld [vmem:[%s1943_s19 + $0xb0] sm:$0xff]  ;;  %v1541_v38 = vld [vmem:[%s1943_s19 + $0xb8] sm:$0xff] }
  0x35   : > { %1569 = vmatpush.bf16.msra.mxu2 %v1554_v3  ;;  %1570 = vmatpush.bf16.msra.mxu3 %v1554_v3  ;;  %v1548_v35 = vld [vmem:[%s1943_s19 + $0xf0] sm:$0xff]  ;;  %v1549_v39 = vld [vmem:[%s1943_s19 + $0xf8] sm:$0xff] }
  0x38   : > { %716 = vmatpush.bf16.msra.mxu0 %v1553_v4  ;;  %1571 = vmatpush.bf16.msra.mxu1 %v1553_v4 }
  0x39   : > { %1572 = vmatpush.bf16.msra.mxu2 %v1553_v4  ;;  %1573 = vmatpush.bf16.msra.mxu3 %v1553_v4 }
  0x3c   : > { %717 = vmatpush.bf16.msra.mxu0 %v1552_v5  ;;  %1574 = vmatpush.bf16.msra.mxu1 %v1552_v5 }
  0x3d   : > { %1575 = vmatpush.bf16.msra.mxu2 %v1552_v5  ;;  %1576 = vmatpush.bf16.msra.mxu3 %v1552_v5 }
  0x40   : > { %718 = vmatpush.bf16.msra.mxu0 %v1551_v6  ;;  %1577 = vmatpush.bf16.msra.mxu1 %v1551_v6 }
  0x41   : > { %1578 = vmatpush.bf16.msra.mxu2 %v1551_v6  ;;  %1579 = vmatpush.bf16.msra.mxu3 %v1551_v6 }
  0x44   : > { %719 = vmatpush.bf16.msra.mxu0 %v1550_v7  ;;  %1580 = vmatpush.bf16.msra.mxu1 %v1550_v7 }
  0x45   : > { %1581 = vmatpush.bf16.msra.mxu2 %v1550_v7  ;;  %1582 = vmatpush.bf16.msra.mxu3 %v1550_v7 }
  0x47   : > { %720 = vmatmul.bf16.vlgmr.msra.gmra.mxu0 %v1518_v8  ;;  %760 = vmatmul.bf16.vlgmr.msra.gmra.mxu1 %v1526_v9 }
  0x48   : > { %800 = vmatmul.bf16.vlgmr.msra.gmra.mxu2 %v1534_v10  ;;  %840 = vmatmul.bf16.vlgmr.msra.gmra.mxu3 %v1542_v11 }
  0x57   : > { %725 = vmatmul.bf16.gmra.mxu0 %v1519_v12  ;;  %765 = vmatmul.bf16.gmra.mxu1 %v1527_v13 }
  0x58   : > { %805 = vmatmul.bf16.gmra.mxu2 %v1535_v14  ;;  %845 = vmatmul.bf16.gmra.mxu3 %v1543_v15 }
  0x67   : > { %730 = vmatmul.bf16.gmra.mxu0 %v1520_v16  ;;  %770 = vmatmul.bf16.gmra.mxu1 %v1528_v17 }
  0x68   : > { %810 = vmatmul.bf16.gmra.mxu2 %v1536_v18  ;;  %850 = vmatmul.bf16.gmra.mxu3 %v1544_v19 }
  0x77   : > { %735 = vmatmul.bf16.gmra.mxu0 %v1521_v20  ;;  %775 = vmatmul.bf16.gmra.mxu1 %v1529_v21 }
  0x78   : > { %815 = vmatmul.bf16.gmra.mxu2 %v1537_v22  ;;  %855 = vmatmul.bf16.gmra.mxu3 %v1545_v23 }
  0x87   : > { %740 = vmatmul.bf16.gmra.mxu0 %v1522_v24  ;;  %780 = vmatmul.bf16.gmra.mxu1 %v1530_v25 }
  0x88   : > { %820 = vmatmul.bf16.gmra.mxu2 %v1538_v26  ;;  %860 = vmatmul.bf16.gmra.mxu3 %v1546_v27 }
  0x97   : > { %745 = vmatmul.bf16.gmra.mxu0 %v1523_v28  ;;  %785 = vmatmul.bf16.gmra.mxu1 %v1531_v29 }
  0x98   : > { %825 = vmatmul.bf16.gmra.mxu2 %v1539_v30  ;;  %865 = vmatmul.bf16.gmra.mxu3 %v1547_v31 }
  0xa7   : > { %750 = vmatmul.bf16.gmra.mxu0 %v1524_v32  ;;  %790 = vmatmul.bf16.gmra.mxu1 %v1532_v33 }
  0xa8   : > { %830 = vmatmul.bf16.gmra.mxu2 %v1540_v34  ;;  %870 = vmatmul.bf16.gmra.mxu3 %v1548_v35 }
  0xb7   : > { %755 = vmatmul.bf16.gmra.mxu0 %v1525_v36  ;;  %795 = vmatmul.bf16.gmra.mxu1 %v1533_v37 }
  0xb8   : > { %835 = vmatmul.bf16.gmra.mxu2 %v1541_v38  ;;  %875 = vmatmul.bf16.gmra.mxu3 %v1549_v39 }
  0xc4   : > { %v721_v41 = vpop.f32.mrf.mxu0  ;;  %v761_v42 = vpop.f32.mrf.mxu1 }
  0xc5   : > { %v1080_v43 = vadd.f32 %v1989_v40, %v721_v41  ;;  %v1096_v44 = vadd.f32 %v1989_v40, %v761_v42 }
  0xc7   : > { %1144 = vst [vmem:[%s1993_s27] sm:$0xff] %v1080_v43 }
  0xc8   : > { %1160 = vst [vmem:[%s1993_s27 + $0x80] sm:$0xff] %v1096_v44 }
  0xcb   : > { %v801_v45 = vpop.f32.mrf.mxu2  ;;  %v841_v46 = vpop.f32.mrf.mxu3 }
  0xcc   : > { %v1112_v47 = vadd.f32 %v1989_v40, %v801_v45  ;;  %v1128_v48 = vadd.f32 %v1989_v40, %v841_v46  ;;  %v723_v49 = vpop.f32.mrf.mxu0  ;;  %v763_v50 = vpop.f32.mrf.mxu1 }
  0xcd   : > { %v1081_v51 = vadd.f32 %v1989_v40, %v723_v49  ;;  %v1097_v52 = vadd.f32 %v1989_v40, %v763_v50 }
  0xce   : > { %1176 = vst [vmem:[%s1993_s27 + $0x100] sm:$0xff] %v1112_v47 }
  0xcf   : > { %1192 = vst [vmem:[%s1993_s27 + $0x180] sm:$0xff] %v1128_v48 }
  0xd0   : > { %1145 = vst [vmem:[%s1993_s27 + $0x8] sm:$0xff] %v1081_v51 }
  0xd1   : > { %1161 = vst [vmem:[%s1993_s27 + $0x88] sm:$0xff] %v1097_v52 }
  0xd3   : > { %v803_v53 = vpop.f32.mrf.mxu2  ;;  %v843_v54 = vpop.f32.mrf.mxu3 }
  0xd4   : > { %v1113_v55 = vadd.f32 %v1989_v40, %v803_v53  ;;  %v1129_v56 = vadd.f32 %v1989_v40, %v843_v54  ;;  %v726_v57 = vpop.f32.mrf.mxu0  ;;  %v766_v58 = vpop.f32.mrf.mxu1 }
  0xd5   : > { %v1082_v59 = vadd.f32 %v1989_v40, %v726_v57  ;;  %v1098_v60 = vadd.f32 %v1989_v40, %v766_v58 }
  0xd6   : > { %1177 = vst [vmem:[%s1993_s27 + $0x108] sm:$0xff] %v1113_v55 }
  0xd7   : > { %1193 = vst [vmem:[%s1993_s27 + $0x188] sm:$0xff] %v1129_v56 }
  0xd8   : > { %1146 = vst [vmem:[%s1993_s27 + $0x10] sm:$0xff] %v1082_v59 }
  0xd9   : > { %1162 = vst [vmem:[%s1993_s27 + $0x90] sm:$0xff] %v1098_v60 }
  0xdb   : > { %v806_v61 = vpop.f32.mrf.mxu2  ;;  %v846_v62 = vpop.f32.mrf.mxu3 }
  0xdc   : > { %v1114_v63 = vadd.f32 %v1989_v40, %v806_v61  ;;  %v1130_v0 = vadd.f32 %v1989_v40, %v846_v62  ;;  %v728_v1 = vpop.f32.mrf.mxu0  ;;  %v768_v2 = vpop.f32.mrf.mxu1 }
  0xdd   : > { %v1083_v3 = vadd.f32 %v1989_v40, %v728_v1  ;;  %v1099_v4 = vadd.f32 %v1989_v40, %v768_v2 }
  0xde   : > { %1178 = vst [vmem:[%s1993_s27 + $0x110] sm:$0xff] %v1114_v63 }
  0xdf   : > { %1194 = vst [vmem:[%s1993_s27 + $0x190] sm:$0xff] %v1130_v0 }
  0xe0   : > { %1147 = vst [vmem:[%s1993_s27 + $0x18] sm:$0xff] %v1083_v3 }
  0xe1   : > { %1163 = vst [vmem:[%s1993_s27 + $0x98] sm:$0xff] %v1099_v4 }
  0xe3   : > { %v808_v5 = vpop.f32.mrf.mxu2  ;;  %v848_v6 = vpop.f32.mrf.mxu3 }
  0xe4   : > { %v1115_v7 = vadd.f32 %v1989_v40, %v808_v5  ;;  %v1131_v8 = vadd.f32 %v1989_v40, %v848_v6  ;;  %v731_v9 = vpop.f32.mrf.mxu0  ;;  %v771_v10 = vpop.f32.mrf.mxu1 }
  0xe5   : > { %v1084_v11 = vadd.f32 %v1989_v40, %v731_v9  ;;  %v1100_v12 = vadd.f32 %v1989_v40, %v771_v10 }
  0xe6   : > { %1179 = vst [vmem:[%s1993_s27 + $0x118] sm:$0xff] %v1115_v7 }
  0xe7   : > { %1195 = vst [vmem:[%s1993_s27 + $0x198] sm:$0xff] %v1131_v8 }
  0xe8   : > { %1148 = vst [vmem:[%s1993_s27 + $0x20] sm:$0xff] %v1084_v11 }
  0xe9   : > { %1164 = vst [vmem:[%s1993_s27 + $0xa0] sm:$0xff] %v1100_v12 }
  0xeb   : > { %v811_v13 = vpop.f32.mrf.mxu2  ;;  %v851_v14 = vpop.f32.mrf.mxu3 }
  0xec   : > { %v1116_v15 = vadd.f32 %v1989_v40, %v811_v13  ;;  %v1132_v16 = vadd.f32 %v1989_v40, %v851_v14  ;;  %v733_v17 = vpop.f32.mrf.mxu0  ;;  %v773_v18 = vpop.f32.mrf.mxu1 }
  0xed   : > { %v1085_v19 = vadd.f32 %v1989_v40, %v733_v17  ;;  %v1101_v20 = vadd.f32 %v1989_v40, %v773_v18 }
  0xee   : > { %1180 = vst [vmem:[%s1993_s27 + $0x120] sm:$0xff] %v1116_v15 }
  0xef   : > { %1196 = vst [vmem:[%s1993_s27 + $0x1a0] sm:$0xff] %v1132_v16 }
  0xf0   : > { %1149 = vst [vmem:[%s1993_s27 + $0x28] sm:$0xff] %v1085_v19 }
  0xf1   : > { %1165 = vst [vmem:[%s1993_s27 + $0xa8] sm:$0xff] %v1101_v20 }
  0xf3   : > { %v813_v21 = vpop.f32.mrf.mxu2  ;;  %v853_v22 = vpop.f32.mrf.mxu3 }
  0xf4   : > { %v1117_v23 = vadd.f32 %v1989_v40, %v813_v21  ;;  %v1133_v24 = vadd.f32 %v1989_v40, %v853_v22  ;;  %v736_v25 = vpop.f32.mrf.mxu0  ;;  %v776_v26 = vpop.f32.mrf.mxu1 }
  0xf5   : > { %v1086_v27 = vadd.f32 %v1989_v40, %v736_v25  ;;  %v1102_v28 = vadd.f32 %v1989_v40, %v776_v26 }
  0xf6   : > { %1181 = vst [vmem:[%s1993_s27 + $0x128] sm:$0xff] %v1117_v23 }
  0xf7   : > { %1197 = vst [vmem:[%s1993_s27 + $0x1a8] sm:$0xff] %v1133_v24 }
  0xf8   : > { %1150 = vst [vmem:[%s1993_s27 + $0x30] sm:$0xff] %v1086_v27 }
  0xf9   : > { %1166 = vst [vmem:[%s1993_s27 + $0xb0] sm:$0xff] %v1102_v28 }
  0xfb   : > { %v816_v29 = vpop.f32.mrf.mxu2  ;;  %v856_v30 = vpop.f32.mrf.mxu3 }
  0xfc   : > { %v1118_v31 = vadd.f32 %v1989_v40, %v816_v29  ;;  %v1134_v32 = vadd.f32 %v1989_v40, %v856_v30  ;;  %v738_v33 = vpop.f32.mrf.mxu0  ;;  %v778_v34 = vpop.f32.mrf.mxu1 }
  0xfd   : > { %v1087_v35 = vadd.f32 %v1989_v40, %v738_v33  ;;  %v1103_v36 = vadd.f32 %v1989_v40, %v778_v34 }
  0xfe   : > { %1182 = vst [vmem:[%s1993_s27 + $0x130] sm:$0xff] %v1118_v31 }
  0xff   : > { %1198 = vst [vmem:[%s1993_s27 + $0x1b0] sm:$0xff] %v1134_v32 }
 0x100   : > { %1151 = vst [vmem:[%s1993_s27 + $0x38] sm:$0xff] %v1087_v35 }
 0x101   : > { %1167 = vst [vmem:[%s1993_s27 + $0xb8] sm:$0xff] %v1103_v36 }
 0x103   : > { %v818_v37 = vpop.f32.mrf.mxu2  ;;  %v858_v38 = vpop.f32.mrf.mxu3 }
 0x104   : > { %v1119_v39 = vadd.f32 %v1989_v40, %v818_v37  ;;  %v1135_v41 = vadd.f32 %v1989_v40, %v858_v38  ;;  %v741_v42 = vpop.f32.mrf.mxu0  ;;  %v781_v43 = vpop.f32.mrf.mxu1 }
 0x105   : > { %v1088_v44 = vadd.f32 %v1989_v40, %v741_v42  ;;  %v1104_v45 = vadd.f32 %v1989_v40, %v781_v43 }
 0x106   : > { %1183 = vst [vmem:[%s1993_s27 + $0x138] sm:$0xff] %v1119_v39 }
 0x107   : > { %1199 = vst [vmem:[%s1993_s27 + $0x1b8] sm:$0xff] %v1135_v41 }
 0x108   : > { %1152 = vst [vmem:[%s1993_s27 + $0x40] sm:$0xff] %v1088_v44 }
 0x109   : > { %1168 = vst [vmem:[%s1993_s27 + $0xc0] sm:$0xff] %v1104_v45 }
 0x10b   : > { %v821_v46 = vpop.f32.mrf.mxu2  ;;  %v861_v47 = vpop.f32.mrf.mxu3 }
 0x10c   : > { %v1120_v48 = vadd.f32 %v1989_v40, %v821_v46  ;;  %v1136_v49 = vadd.f32 %v1989_v40, %v861_v47  ;;  %v743_v50 = vpop.f32.mrf.mxu0  ;;  %v783_v51 = vpop.f32.mrf.mxu1 }
 0x10d   : > { %v1089_v52 = vadd.f32 %v1989_v40, %v743_v50  ;;  %v1105_v53 = vadd.f32 %v1989_v40, %v783_v51 }
 0x10e   : > { %1184 = vst [vmem:[%s1993_s27 + $0x140] sm:$0xff] %v1120_v48 }
 0x10f   : > { %1200 = vst [vmem:[%s1993_s27 + $0x1c0] sm:$0xff] %v1136_v49 }
 0x110   : > { %1153 = vst [vmem:[%s1993_s27 + $0x48] sm:$0xff] %v1089_v52 }
 0x111   : > { %1169 = vst [vmem:[%s1993_s27 + $0xc8] sm:$0xff] %v1105_v53 }
 0x113   : > { %v823_v54 = vpop.f32.mrf.mxu2  ;;  %v863_v55 = vpop.f32.mrf.mxu3 }
 0x114   : > { %v1121_v56 = vadd.f32 %v1989_v40, %v823_v54  ;;  %v1137_v57 = vadd.f32 %v1989_v40, %v863_v55  ;;  %v746_v58 = vpop.f32.mrf.mxu0  ;;  %v786_v59 = vpop.f32.mrf.mxu1 }
 0x115   : > { %v1090_v60 = vadd.f32 %v1989_v40, %v746_v58  ;;  %v1106_v61 = vadd.f32 %v1989_v40, %v786_v59 }
 0x116   : > { %1185 = vst [vmem:[%s1993_s27 + $0x148] sm:$0xff] %v1121_v56 }
 0x117   : > { %1201 = vst [vmem:[%s1993_s27 + $0x1c8] sm:$0xff] %v1137_v57 }
 0x118   : > { %1154 = vst [vmem:[%s1993_s27 + $0x50] sm:$0xff] %v1090_v60 }
 0x119   : > { %1170 = vst [vmem:[%s1993_s27 + $0xd0] sm:$0xff] %v1106_v61 }
 0x11b   : > { %v826_v62 = vpop.f32.mrf.mxu2  ;;  %v866_v63 = vpop.f32.mrf.mxu3 }
 0x11c   : > { %v1122_v0 = vadd.f32 %v1989_v40, %v826_v62  ;;  %v1138_v1 = vadd.f32 %v1989_v40, %v866_v63  ;;  %v748_v2 = vpop.f32.mrf.mxu0  ;;  %v788_v3 = vpop.f32.mrf.mxu1 }
 0x11d   : > { %v1091_v4 = vadd.f32 %v1989_v40, %v748_v2  ;;  %v1107_v5 = vadd.f32 %v1989_v40, %v788_v3 }
 0x11e   : > { %1186 = vst [vmem:[%s1993_s27 + $0x150] sm:$0xff] %v1122_v0 }
 0x11f   : > { %1202 = vst [vmem:[%s1993_s27 + $0x1d0] sm:$0xff] %v1138_v1 }
 0x120   : > { %1155 = vst [vmem:[%s1993_s27 + $0x58] sm:$0xff] %v1091_v4 }
 0x121   : > { %1171 = vst [vmem:[%s1993_s27 + $0xd8] sm:$0xff] %v1107_v5 }
 0x123   : > { %v828_v6 = vpop.f32.mrf.mxu2  ;;  %v868_v7 = vpop.f32.mrf.mxu3 }
 0x124   : > { %v1123_v8 = vadd.f32 %v1989_v40, %v828_v6  ;;  %v1139_v9 = vadd.f32 %v1989_v40, %v868_v7  ;;  %v751_v10 = vpop.f32.mrf.mxu0  ;;  %v791_v11 = vpop.f32.mrf.mxu1 }
 0x125   : > { %v1092_v12 = vadd.f32 %v1989_v40, %v751_v10  ;;  %v1108_v13 = vadd.f32 %v1989_v40, %v791_v11 }
 0x126   : > { %1187 = vst [vmem:[%s1993_s27 + $0x158] sm:$0xff] %v1123_v8 }
 0x127   : > { %1203 = vst [vmem:[%s1993_s27 + $0x1d8] sm:$0xff] %v1139_v9 }
 0x128   : > { %1156 = vst [vmem:[%s1993_s27 + $0x60] sm:$0xff] %v1092_v12 }
 0x129   : > { %1172 = vst [vmem:[%s1993_s27 + $0xe0] sm:$0xff] %v1108_v13 }
 0x12b   : > { %v831_v14 = vpop.f32.mrf.mxu2  ;;  %v871_v15 = vpop.f32.mrf.mxu3 }
 0x12c   : > { %v1124_v16 = vadd.f32 %v1989_v40, %v831_v14  ;;  %v1140_v17 = vadd.f32 %v1989_v40, %v871_v15  ;;  %v753_v18 = vpop.f32.mrf.mxu0  ;;  %v793_v19 = vpop.f32.mrf.mxu1 }
 0x12d   : > { %v1093_v20 = vadd.f32 %v1989_v40, %v753_v18  ;;  %v1109_v21 = vadd.f32 %v1989_v40, %v793_v19 }
 0x12e   : > { %1188 = vst [vmem:[%s1993_s27 + $0x160] sm:$0xff] %v1124_v16 }
 0x12f   : > { %1204 = vst [vmem:[%s1993_s27 + $0x1e0] sm:$0xff] %v1140_v17 }
 0x130   : > { %1157 = vst [vmem:[%s1993_s27 + $0x68] sm:$0xff] %v1093_v20 }
 0x131   : > { %1173 = vst [vmem:[%s1993_s27 + $0xe8] sm:$0xff] %v1109_v21 }
 0x133   : > { %v833_v22 = vpop.f32.mrf.mxu2  ;;  %v873_v23 = vpop.f32.mrf.mxu3 }
 0x134   : > { %v1125_v24 = vadd.f32 %v1989_v40, %v833_v22  ;;  %v1141_v25 = vadd.f32 %v1989_v40, %v873_v23  ;;  %v756_v26 = vpop.f32.mrf.mxu0  ;;  %v796_v27 = vpop.f32.mrf.mxu1 }
 0x135   : > { %v1094_v28 = vadd.f32 %v1989_v40, %v756_v26  ;;  %v1110_v29 = vadd.f32 %v1989_v40, %v796_v27 }
 0x136   : > { %1189 = vst [vmem:[%s1993_s27 + $0x168] sm:$0xff] %v1125_v24 }
 0x137   : > { %1205 = vst [vmem:[%s1993_s27 + $0x1e8] sm:$0xff] %v1141_v25 }
 0x138   : > { %1158 = vst [vmem:[%s1993_s27 + $0x70] sm:$0xff] %v1094_v28 }
 0x139   : > { %1174 = vst [vmem:[%s1993_s27 + $0xf0] sm:$0xff] %v1110_v29 }
 0x13b   : > { %v836_v30 = vpop.f32.mrf.mxu2  ;;  %v876_v31 = vpop.f32.mrf.mxu3 }
 0x13c   : > { %v1126_v32 = vadd.f32 %v1989_v40, %v836_v30  ;;  %v1142_v33 = vadd.f32 %v1989_v40, %v876_v31  ;;  %v758_v34 = vpop.f32.mrf.mxu0  ;;  %v798_v35 = vpop.f32.mrf.mxu1 }
 0x13d   : > { %v1095_v36 = vadd.f32 %v1989_v40, %v758_v34  ;;  %v1111_v37 = vadd.f32 %v1989_v40, %v798_v35 }
 0x13e   : > { %1190 = vst [vmem:[%s1993_s27 + $0x170] sm:$0xff] %v1126_v32 }
 0x13f   : > { %1206 = vst [vmem:[%s1993_s27 + $0x1f0] sm:$0xff] %v1142_v33 }
 0x140   : > { %1159 = vst [vmem:[%s1993_s27 + $0x78] sm:$0xff] %v1095_v36 }
 0x141   : > { %1175 = vst [vmem:[%s1993_s27 + $0xf8] sm:$0xff] %v1111_v37 }
 0x143   : > { %v838_v38 = vpop.f32.mrf.mxu2  ;;  %v878_v39 = vpop.f32.mrf.mxu3 }
 0x144   : > { %v1127_v41 = vadd.f32 %v1989_v40, %v838_v38  ;;  %v1143_v42 = vadd.f32 %v1989_v40, %v878_v39 }
 0x146   : > { %1191 = vst [vmem:[%s1993_s27 + $0x178] sm:$0xff] %v1127_v41 }
 0x147   : > { %1207 = vst [vmem:[%s1993_s27 + $0x1f8] sm:$0xff] %v1143_v42 }
 0x148   : > { %1748 = shalt.err (!%p1745_p0)
}
 0x149   : > { %s1812_s6 = smov 128   ;;  %s1813_s1 = smov 8  }
 0x14a   : > { %1589 = dma.vmem_to_hbm [thread:$0]  (%p1916_p5), %s1223_s15, 8192, %s1225_s24, %s1209_s25, %s1812_s6, %s1812_s6, %s1813_s1  }
 0x14b PF: > { %s1239_s20 = sand.u32 1, %s1787_s12   ;;  %p1600_p3 = pnand %p1344_p11, %p1883_p6 }
 0x14c   : > { %s1240_s22 = scalar_lea.sflag [#allocation5], %s1239_s20 }
 0x14d   : > { %p1601_p7 = pneg %p1600_p3 }
 0x14f   : > { %1782 = dma.done.wait (%p1601_p7), %s1240_s22, 8192  }
 0x150   : > { %1784 = vsyncadd (%p1601_p7), %s1240_s22, 4294959104  ;;  %s20_s17 = sadd.s32 1, %s1807_s17   ;;  %s2175_s12 = smov %s1791_s13 }
 0x151   : > { %p17_p9 = scmp.ge.s32.totalorder %s20_s17, 4   ;;  %s2176_s13 = smov %s1795_s14 }
 0x152   : > { %s2177_s14 = smov %s1925_s18  ;;  %s2178_s15 = smov %s1803_s16 }
 0x153   : > { %s2179_s16 = smov %s2181_s5  ;;  %19 = sbr.rel (!%p17_p9) target bundleno = 9 (0x9), region = 93 }
 0x158   :  { %1246 = vsyncpa [#allocation4], 1 }
 0x159   :  { %1248 = vsyncpa [#allocation4 + $0x1], 1 }
 0x15a   :  { %1249 = vsyncpa [#allocation7], 1 }
 0x15b   :  { %1250 = vsyncpa [#allocation5], 1 }
 0x15c   :  { %1252 = vsyncpa [#allocation5 + $0x1], 1 }

</bundles_post_ra>
